<compile_context>
chip_gen: v5e
topology: v5e:2x2
jax: 0.10.0
libtpu: 0.0.40
codegen_flags: <defaults>
</compile_context>

<pallas_src>
import functools

import numpy as np
import jax
import jax.numpy as jnp
from jax.experimental import pallas as pl
from jax.experimental.pallas import tpu as pltpu

K = 20
_LANE = 128
_SUBLANE = 8


def _round_up(x, m):
    return (x + m - 1) // m * m


def _cdiv(a, b):
    return -(-a // b)


def _spline_mlp_kernel(x_ref, w1_ref, b1_ref, w2_ref, b2_ref, w3_ref, b3_ref,
                       o_ref, *, compute_dtype, vpu_layer1):
    x = x_ref[...]

    # ---- Layer 1: Linear(D, H1) + ReLU -------------------------------------
    if vpu_layer1:
        # D is tiny (e.g. 4): D broadcast FMAs on the VPU instead of a heavily
        # padded f32 MXU pass.
        h = x[:, 0:1] * w1_ref[0:1, :]
        for d in range(1, x_ref.shape[1]):
            h = h + x[:, d:d + 1] * w1_ref[d:d + 1, :]
        h = h + b1_ref[...]
    else:
        h = jnp.dot(x.astype(compute_dtype),
                    w1_ref[...].astype(compute_dtype),
                    preferred_element_type=jnp.float32) + b1_ref[...]
    h = jnp.maximum(h, 0.0)

    # ---- Layer 2: Linear(H1, H2) + ReLU ------------------------------------
    h = jnp.dot(h.astype(compute_dtype), w2_ref[...].astype(compute_dtype),
                preferred_element_type=jnp.float32) + b2_ref[...]
    h = jnp.maximum(h, 0.0)

    # ---- Layer 3: Linear(H2, D*(3K-1)) -------------------------------------
    # Store straight into the (tb, 236)-wide output block: the final lane
    # group is a masked vst (cheap) and there is no extra HBM pass over the
    # output in the wrapper.
    y = jnp.dot(h.astype(compute_dtype), w3_ref[...].astype(compute_dtype),
                preferred_element_type=jnp.float32) + b3_ref[...]
    o_ref[...] = y.astype(o_ref.dtype)


def spline_forward(x, params, *, tile_b=2048, compute_dtype=jnp.float32,
                   out_dtype=None):
    """x: (B, D) float32. params: dict of (in,out) weights and (1,out) biases.

    Returns (B, D*(3K-1)); dtype = out_dtype (default: x.dtype).
    """
    w1, b1 = params["w1"], params["b1"]
    w2, b2 = params["w2"], params["b2"]
    w3, b3 = params["w3"], params["b3"]
    B, D = x.shape
    h1, h2 = w1.shape[1], w2.shape[1]
    out_dim = w3.shape[1]
    out_dtype = x.dtype if out_dtype is None else np.dtype(out_dtype)
    out_itemsize = np.dtype(out_dtype).itemsize

    # Batch tiling: no padding of x and no output slice.  Pick tb so that
    #   * tb is a multiple of 8 (sublane granularity),
    #   * the grid has >= 2 steps whenever B > 8 (both v7x TensorCores busy),
    #   * tb <= tile_b (VMEM budget; the 2048 default fits the v5e 16 MiB
    #     scoped default with double-buffered in/out blocks).
    # The ragged boundary block (B not a multiple of tb) is masked by Pallas
    # on both the input DMA and the output writeback.
    n_tiles = max(1, _cdiv(B, tile_b))
    if B > _SUBLANE:
        n_tiles = max(n_tiles, 2)
    tb = max(_SUBLANE, _round_up(_cdiv(B, n_tiles), _SUBLANE))
    grid = (pl.cdiv(B, tb),)

    flops = 2 * B * (D * h1 + h1 * h2 + h2 * out_dim)
    bytes_accessed = int(
        x.size * x.dtype.itemsize
        + sum(int(p.size) * p.dtype.itemsize for p in (w1, b1, w2, b2, w3, b3))
        + B * out_dim * out_itemsize)
    cost = pl.CostEstimate(flops=flops, transcendentals=0,
                           bytes_accessed=bytes_accessed)

    # Rough per-step VMEM: double-buffered x/out blocks + live f32
    # intermediates + resident weights (lane dims rounded to 128).
    vmem_needed = (
        2 * tb * _round_up(D, _LANE) * x.dtype.itemsize
        + 2 * tb * _round_up(out_dim, _LANE) * out_itemsize
        + 4 * tb * _round_up(max(h1, h2), _LANE) * 4
        + sum(int(p.size) * 4 for p in (w1, b1, w2, b2, w3, b3)))
    compiler_kwargs = dict(dimension_semantics=("parallel",))
    if vmem_needed > 14 * (1 << 20):
        # Raise the scoped-VMEM limit past the v5e 16 MiB default only when a
        # larger batch tile is requested; stay under the v7x 64 MiB physical.
        compiler_kwargs["vmem_limit_bytes"] = min(
            int(vmem_needed * 3 // 2), 56 * (1 << 20))

    vpu_layer1 = (D <= 8) and (np.dtype(compute_dtype) == np.dtype(jnp.float32))
    kernel = functools.partial(_spline_mlp_kernel,
                               compute_dtype=compute_dtype,
                               vpu_layer1=vpu_layer1)

    # Weights/biases: full blocks with constant index_map -> stay resident in
    # VMEM for every batch tile (no re-DMA per grid step).
    def const_spec(a):
        return pl.BlockSpec(a.shape, lambda i: (0,) * a.ndim)

    out = pl.pallas_call(
        kernel,
        out_shape=jax.ShapeDtypeStruct((B, out_dim), out_dtype),
        grid=grid,
        in_specs=[
            pl.BlockSpec((tb, D), lambda i: (i, 0)),
            const_spec(w1), const_spec(b1),
            const_spec(w2), const_spec(b2),
            const_spec(w3), const_spec(b3),
        ],
        out_specs=pl.BlockSpec((tb, out_dim), lambda i: (i, 0)),
        compiler_params=pltpu.CompilerParams(**compiler_kwargs),
        cost_estimate=cost,
    )(x, w1, b1, w2, b2, w3, b3)
    return out


def init_spline_params(key, D, hidden):
    """Mirrors torch.nn.Linear default init (U[-1/sqrt(fan_in), 1/sqrt(fan_in)]).

    Weights stored as (in, out); biases as (1, out) for in-kernel broadcasting.
    Layer dims: D -> hidden[0] -> ... -> hidden[-1] -> D*(3K-1).
    """
    dims = [D] + list(hidden) + [D * (3 * K - 1)]
    params = {}
    for i in range(len(dims) - 1):
        fan_in, fan_out = dims[i], dims[i + 1]
        key, kw, kb = jax.random.split(key, 3)
        bound = 1.0 / jnp.sqrt(fan_in)
        params[f"w{i+1}"] = jax.random.uniform(
            kw, (fan_in, fan_out), jnp.float32, -bound, bound)
        params[f"b{i+1}"] = jax.random.uniform(
            kb, (1, fan_out), jnp.float32, -bound, bound)
    return params


def spline_reference(x, params):
    """Plain JAX reference of the same MLP for a sanity check."""
    h = x @ params["w1"] + params["b1"]
    h = jnp.maximum(h, 0.0)
    h = h @ params["w2"] + params["b2"]
    h = jnp.maximum(h, 0.0)
    return h @ params["w3"] + params["b3"]


if __name__ == "__main__":
    D = 4
    hidden = [32, 32]          # Spline(D, hidden) -> get_layers(D, hidden, is_spline=True)
    out_dim = D * (3 * K - 1)  # 236

    key = jax.random.PRNGKey(0)
    key, kx = jax.random.split(key)
    params = init_spline_params(key, D, hidden)

    # Small batch (single grid tile).
    B = 8
    x = jax.random.normal(kx, (B, D), jnp.float32)
    out = jax.block_until_ready(spline_forward(x, params))
    ref = spline_reference(x, params)
    assert out.shape == (B, out_dim), out.shape
    assert jnp.allclose(out, ref, atol=1e-4, rtol=1e-4), "mismatch vs reference (B=8)"

    # Larger, awkward batch: 2-tile grid with a ragged boundary block,
    # no batch padding and no wrapper-side output slice.
    key, kx2 = jax.random.split(key)
    B2 = 2500
    x2 = jax.random.normal(kx2, (B2, D), jnp.float32)
    out2 = jax.block_until_ready(spline_forward(x2, params, tile_b=2048))
    ref2 = spline_reference(x2, params)
    assert out2.shape == (B2, out_dim), out2.shape
    assert jnp.allclose(out2, ref2, atol=1e-4, rtol=1e-4), "mismatch vs reference (B=2500)"

    # Optional reduced-precision path: bf16 MXU operands (f32 accumulation)
    # and a bf16 output stream (halves the dominant HBM write traffic).
    out3 = jax.block_until_ready(
        spline_forward(x2, params, tile_b=2048,
                       compute_dtype=jnp.bfloat16, out_dtype=jnp.bfloat16))
    assert out3.shape == (B2, out_dim) and out3.dtype == jnp.bfloat16
    assert jnp.allclose(out3.astype(jnp.float32), ref2, atol=1e-1, rtol=1e-1), \
        "mismatch vs reference (bf16 path)"

    print("KERNEL_OK")
</pallas_src>

<mosaic_0001>
module attributes {stable_mosaic.version = 11 : i64} {
  func.func @_spline_mlp_kernel(%arg0: i32, %arg1: memref<8x4xf32, #tpu.memory_space<vmem>>, %arg2: memref<4x32xf32, #tpu.memory_space<vmem>>, %arg3: memref<1x32xf32, #tpu.memory_space<vmem>>, %arg4: memref<32x32xf32, #tpu.memory_space<vmem>>, %arg5: memref<1x32xf32, #tpu.memory_space<vmem>>, %arg6: memref<32x236xf32, #tpu.memory_space<vmem>>, %arg7: memref<1x236xf32, #tpu.memory_space<vmem>>, %arg8: memref<8x236xf32, #tpu.memory_space<vmem>>) attributes {dimension_semantics = [#tpu.dimension_semantics<parallel>], iteration_bounds = array<i64: 1>, scalar_prefetch = 0 : i64, scratch_operands = 0 : i64, tpu.core_type = #tpu.core_type<tc>, window_params = [{transform_indices = @transform_0, window_bounds = array<i64: 8, 4>}, {pipeline_mode = #tpu.pipeline_mode<synchronous>, transform_indices = @transform_1, window_bounds = array<i64: 4, 32>}, {pipeline_mode = #tpu.pipeline_mode<synchronous>, transform_indices = @transform_2, window_bounds = array<i64: 1, 32>}, {pipeline_mode = #tpu.pipeline_mode<synchronous>, transform_indices = @transform_3, window_bounds = array<i64: 32, 32>}, {pipeline_mode = #tpu.pipeline_mode<synchronous>, transform_indices = @transform_4, window_bounds = array<i64: 1, 32>}, {pipeline_mode = #tpu.pipeline_mode<synchronous>, transform_indices = @transform_5, window_bounds = array<i64: 32, 236>}, {pipeline_mode = #tpu.pipeline_mode<synchronous>, transform_indices = @transform_6, window_bounds = array<i64: 1, 236>}, {transform_indices = @transform_7, window_bounds = array<i64: 8, 236>}]} {
    %c0 = arith.constant 0 : index
    %c0_0 = arith.constant 0 : index
    %0 = vector.load %arg1[%c0, %c0_0] : memref<8x4xf32, #tpu.memory_space<vmem>>, vector<8x4xf32>
    %1 = vector.extract_strided_slice %0 {offsets = [0, 0], sizes = [8, 1], strides = [1, 1]} : vector<8x4xf32> to vector<8x1xf32>
    %c0_1 = arith.constant 0 : index
    %c0_2 = arith.constant 0 : index
    %2 = vector.load %arg2[%c0_1, %c0_2] : memref<4x32xf32, #tpu.memory_space<vmem>>, vector<1x32xf32>
    %3 = vector.broadcast %1 : vector<8x1xf32> to vector<8x32xf32>
    %4 = vector.broadcast %2 : vector<1x32xf32> to vector<8x32xf32>
    %5 = arith.mulf %3, %4 : vector<8x32xf32>
    %6 = vector.extract_strided_slice %0 {offsets = [0, 1], sizes = [8, 1], strides = [1, 1]} : vector<8x4xf32> to vector<8x1xf32>
    %c1 = arith.constant 1 : index
    %c0_3 = arith.constant 0 : index
    %7 = vector.load %arg2[%c1, %c0_3] : memref<4x32xf32, #tpu.memory_space<vmem>>, vector<1x32xf32>
    %8 = vector.broadcast %6 : vector<8x1xf32> to vector<8x32xf32>
    %9 = vector.broadcast %7 : vector<1x32xf32> to vector<8x32xf32>
    %10 = arith.mulf %8, %9 : vector<8x32xf32>
    %11 = arith.addf %5, %10 : vector<8x32xf32>
    %12 = vector.extract_strided_slice %0 {offsets = [0, 2], sizes = [8, 1], strides = [1, 1]} : vector<8x4xf32> to vector<8x1xf32>
    %c2 = arith.constant 2 : index
    %c0_4 = arith.constant 0 : index
    %13 = vector.load %arg2[%c2, %c0_4] : memref<4x32xf32, #tpu.memory_space<vmem>>, vector<1x32xf32>
    %14 = vector.broadcast %12 : vector<8x1xf32> to vector<8x32xf32>
    %15 = vector.broadcast %13 : vector<1x32xf32> to vector<8x32xf32>
    %16 = arith.mulf %14, %15 : vector<8x32xf32>
    %17 = arith.addf %11, %16 : vector<8x32xf32>
    %18 = vector.extract_strided_slice %0 {offsets = [0, 3], sizes = [8, 1], strides = [1, 1]} : vector<8x4xf32> to vector<8x1xf32>
    %c3 = arith.constant 3 : index
    %c0_5 = arith.constant 0 : index
    %19 = vector.load %arg2[%c3, %c0_5] : memref<4x32xf32, #tpu.memory_space<vmem>>, vector<1x32xf32>
    %20 = vector.broadcast %18 : vector<8x1xf32> to vector<8x32xf32>
    %21 = vector.broadcast %19 : vector<1x32xf32> to vector<8x32xf32>
    %22 = arith.mulf %20, %21 : vector<8x32xf32>
    %23 = arith.addf %17, %22 : vector<8x32xf32>
    %c0_6 = arith.constant 0 : index
    %c0_7 = arith.constant 0 : index
    %24 = vector.load %arg3[%c0_6, %c0_7] : memref<1x32xf32, #tpu.memory_space<vmem>>, vector<1x32xf32>
    %25 = vector.broadcast %24 : vector<1x32xf32> to vector<8x32xf32>
    %26 = arith.addf %23, %25 : vector<8x32xf32>
    %cst = arith.constant 0.000000e+00 : f32
    %27 = vector.broadcast %cst : f32 to vector<8x32xf32>
    %28 = arith.maximumf %26, %27 : vector<8x32xf32>
    %c0_8 = arith.constant 0 : index
    %c0_9 = arith.constant 0 : index
    %29 = vector.load %arg4[%c0_8, %c0_9] : memref<32x32xf32, #tpu.memory_space<vmem>>, vector<32x32xf32>
    %cst_10 = arith.constant dense<0.000000e+00> : vector<8x32xf32>
    %30 = tpu.matmul %28, %29, %cst_10 {dimension_numbers = #tpu.dot_dimension_numbers<[1], [0], [0], [1], [0, 0, 1, 1], [], []>} : vector<8x32xf32>, vector<32x32xf32>, vector<8x32xf32> -> vector<8x32xf32>
    %c0_11 = arith.constant 0 : index
    %c0_12 = arith.constant 0 : index
    %31 = vector.load %arg5[%c0_11, %c0_12] : memref<1x32xf32, #tpu.memory_space<vmem>>, vector<1x32xf32>
    %32 = vector.broadcast %31 : vector<1x32xf32> to vector<8x32xf32>
    %33 = arith.addf %30, %32 : vector<8x32xf32>
    %cst_13 = arith.constant 0.000000e+00 : f32
    %34 = vector.broadcast %cst_13 : f32 to vector<8x32xf32>
    %35 = arith.maximumf %33, %34 : vector<8x32xf32>
    %c0_14 = arith.constant 0 : index
    %c0_15 = arith.constant 0 : index
    %36 = vector.load %arg6[%c0_14, %c0_15] : memref<32x236xf32, #tpu.memory_space<vmem>>, vector<32x236xf32>
    %cst_16 = arith.constant dense<0.000000e+00> : vector<8x236xf32>
    %37 = tpu.matmul %35, %36, %cst_16 {dimension_numbers = #tpu.dot_dimension_numbers<[1], [0], [0], [1], [0, 0, 1, 1], [], []>} : vector<8x32xf32>, vector<32x236xf32>, vector<8x236xf32> -> vector<8x236xf32>
    %c0_17 = arith.constant 0 : index
    %c0_18 = arith.constant 0 : index
    %38 = vector.load %arg7[%c0_17, %c0_18] : memref<1x236xf32, #tpu.memory_space<vmem>>, vector<1x236xf32>
    %39 = vector.broadcast %38 : vector<1x236xf32> to vector<8x236xf32>
    %40 = arith.addf %37, %39 : vector<8x236xf32>
    %c0_19 = arith.constant 0 : index
    %c0_20 = arith.constant 0 : index
    %41 = vector.load %arg8[%c0_19, %c0_20] : memref<8x236xf32, #tpu.memory_space<vmem>>, vector<8x236xf32>
    tpu.vector_store %arg8[%c0_19, %c0_20], %40 {strides = array<i32>} : memref<8x236xf32, #tpu.memory_space<vmem>>, vector<8x236xf32>,
    return
  }
  func.func @transform_0(%arg0: i32) -> (i32, i32) {
    %c0_i32 = arith.constant 0 : i32
    %c0_i32_0 = arith.constant 0 : i32
    return %arg0, %c0_i32 : i32, i32
  }
  func.func @transform_1(%arg0: i32) -> (i32, i32) {
    %c0_i32 = arith.constant 0 : i32
    %c0_i32_0 = arith.constant 0 : i32
    %c0_i32_1 = arith.constant 0 : i32
    return %c0_i32, %c0_i32_0 : i32, i32
  }
  func.func @transform_2(%arg0: i32) -> (i32, i32) {
    %c0_i32 = arith.constant 0 : i32
    %c0_i32_0 = arith.constant 0 : i32
    %c0_i32_1 = arith.constant 0 : i32
    return %c0_i32, %c0_i32_0 : i32, i32
  }
  func.func @transform_3(%arg0: i32) -> (i32, i32) {
    %c0_i32 = arith.constant 0 : i32
    %c0_i32_0 = arith.constant 0 : i32
    %c0_i32_1 = arith.constant 0 : i32
    return %c0_i32, %c0_i32_0 : i32, i32
  }
  func.func @transform_4(%arg0: i32) -> (i32, i32) {
    %c0_i32 = arith.constant 0 : i32
    %c0_i32_0 = arith.constant 0 : i32
    %c0_i32_1 = arith.constant 0 : i32
    return %c0_i32, %c0_i32_0 : i32, i32
  }
  func.func @transform_5(%arg0: i32) -> (i32, i32) {
    %c0_i32 = arith.constant 0 : i32
    %c0_i32_0 = arith.constant 0 : i32
    %c0_i32_1 = arith.constant 0 : i32
    return %c0_i32, %c0_i32_0 : i32, i32
  }
  func.func @transform_6(%arg0: i32) -> (i32, i32) {
    %c0_i32 = arith.constant 0 : i32
    %c0_i32_0 = arith.constant 0 : i32
    %c0_i32_1 = arith.constant 0 : i32
    return %c0_i32, %c0_i32_0 : i32, i32
  }
  func.func @transform_7(%arg0: i32) -> (i32, i32) {
    %c0_i32 = arith.constant 0 : i32
    %c0_i32_0 = arith.constant 0 : i32
    return %arg0, %c0_i32 : i32, i32
  }
}

</mosaic_0001>

<bundles_post_ra>
// kernel: tpu_custom_call.1
= control target key start
LH: loop header
LB: loop body
LE: loop exit
PB: predicated region body
PF: predicated region fallthrough
CT: control target
= control target key end

     0   :  { %12 = vsyncpa [#allocation3], 0  ;;  %s399_s0 = inlined_call_operand.vmem [shape: f32[8,4], index: 0, kind: input, shape index: {}]   ;;  %s400_s1 = inlined_call_operand.vmem [shape: f32[4,32], index: 1, kind: input, shape index: {}]   ;;  %s401_s2 = inlined_call_operand.vmem [shape: f32[1,32], index: 2, kind: input, shape index: {}]   ;;  %s402_s3 = inlined_call_operand.hbm [shape: f32[32,32], index: 3, kind: input, shape index: {}]   ;;  %s403_s4 = inlined_call_operand.vmem [shape: f32[1,32], index: 4, kind: input, shape index: {}]   ;;  %s404_s5 = inlined_call_operand.hbm [shape: f32[32,236], index: 5, kind: input, shape index: {}]   ;;  %s405_s6 = inlined_call_operand.vmem [shape: f32[1,236], index: 6, kind: input, shape index: {}]   ;;  %s406_s7 = inlined_call_operand.hbm [shape: f32[8,236], index: 7, kind: output, shape index: {}]  }
   0x1   :  { %13 = vsyncpa [#allocation6], 0 }
   0x2   :  { %14 = vsyncpa [#allocation4], 0  ;;  %s25_s26 = sshll.u32 %s402_s3, 4  ;;  %s312_s27 = smov [#allocation2]   ;;  %s26_s26 = int_to_ptr.hbm [resolvable:$true] %s25_s26 }
   0x3   :  { %s27_s28 = sshll.u32 %s312_s27, 4  ;;  %s40_s8 = sshll.u32 %s404_s5, 4  ;;  %s28_s28 = int_to_ptr.vmem [resolvable:$true] %s27_s28  ;;  %s41_s8 = int_to_ptr.hbm [resolvable:$true] %s40_s8 }
   0x4   :  { %s313_s9 = smov 128   ;;  %s314_s10 = smov 8  }
   0x5   :  { %33 = dma.hbm_to_vmem [thread:$0]  %s26_s26, 512, %s28_s28, [#allocation3], %s313_s9, %s313_s9, %s314_s10  }
   0x6   :  { %s315_s11 = smov [#allocation5]   ;;  %s316_s13 = smov 256  }
   0x7   :  { %s42_s12 = sshll.u32 %s315_s11, 4  ;;  %s317_s14 = smov 16   ;;  %s43_s12 = int_to_ptr.vmem [resolvable:$true] %s42_s12 }
   0x8   :  { %48 = dma.hbm_to_vmem [thread:$0]  %s41_s8, 1024, %s43_s12, [#allocation6], %s316_s13, %s316_s13, %s317_s14  }
   0x9   :  { %306 = dma.done.wait [#allocation3], 512  }
   0xa   :  { %307 = vsyncadd [#allocation3], 4294966784 }
   0xb   :  { %308 = dma.done.wait [#allocation6], 1024  }
   0xc   :  { %309 = vsyncadd [#allocation6], 4294966272  ;;  %v318_v0 = vmov 0   ;;  %v319_v1 = vmov 2   ;;  %v59_v2 = vld [vmem:[%s399_s0] sm:$0xff]  ;;  %v320_v3 = vmov 1  }
   0xd   :  { %223 = vset.pattern.permute.xlu0 %v318_v0  ;;  %225 = vset.pattern.permute.xlu1 %v319_v1  ;;  %v321_v4 = vmov 3   ;;  %v101_v5 = vld [vmem:[#allocation2 + $0x18] sm:$0xff]  ;;  %v100_v6 = vld [vmem:[#allocation2 + $0x10] sm:$0xff]  ;;  %v99_v7 = vld [vmem:[#allocation2 + $0x8] sm:$0xff]  ;;  %vm106_vm0 = vcmask 261120   ;;  %s322_s26 = smov [#allocation7]  }
   0xe   :  { %63 = vperm.xlu0 %223, %v59_v2   ;;  %78 = vperm.xlu1 %225, %v59_v2   ;;  %v98_v8 = vld [vmem:[#allocation2] sm:$0xff]  ;;  %v137_v9 = vld [vmem:[#allocation5 + $0x30] sm:$0xff]  ;;  %v138_v10 = vld [vmem:[#allocation5 + $0x38] sm:$0xff]  ;;  %s196_s27 = sshll.u32 %s322_s26, 4  ;;  %s198_s29 = sshll.u32 %s406_s7, 4  ;;  %vm189_vm1 = vcmask 883712   ;;  %s197_s27 = int_to_ptr.vmem [resolvable:$true] %s196_s27  ;;  %s199_s29 = int_to_ptr.hbm [resolvable:$true] %s198_s29 }
   0xf   :  { %122 = vmatpush.msra.mxu0 %v101_v5  ;;  %160 = vmatpush.msra.mxu1 %v137_v9  ;;  %v228_v13 = vld [vmem:[%s400_s1] ss:$0 sm:$0xff]  ;;  %v230_v14 = vld [vmem:[%s400_s1 + $0x1] ss:$0 sm:$0xff]  ;;  %v229_v15 = vld [vmem:[%s400_s1 + $0x2] ss:$0 sm:$0xff] }
  0x10   :  { %180 = vmatpush.msra.mxu2 %v138_v10  ;;  %v231_v16 = vld [vmem:[%s400_s1 + $0x3] ss:$0 sm:$0xff]  ;;  %v232_v25 = vld [vmem:[%s401_s2] ss:$0 sm:$0xff]  ;;  %v136_v30 = vld [vmem:[#allocation5 + $0x28] sm:$0xff] }
  0x11   :  { %123 = vmatpush.msra.mxu0 %v100_v6  ;;  %v135_v29 = vld [vmem:[#allocation5 + $0x20] sm:$0xff]  ;;  %v133_v31 = vld [vmem:[#allocation5 + $0x10] sm:$0xff]  ;;  %v134_v32 = vld [vmem:[#allocation5 + $0x18] sm:$0xff] }
  0x12   :  { %161 = vmatpush.msra.mxu1 %v135_v29  ;;  %181 = vmatpush.msra.mxu2 %v136_v30  ;;  %v131_v33 = vld [vmem:[#allocation5] sm:$0xff]  ;;  %v132_v34 = vld [vmem:[#allocation5 + $0x8] sm:$0xff] }
  0x13   :  { %124 = vmatpush.msra.mxu0 %v99_v7  ;;  %v233_v35 = vld [vmem:[%s403_s4] ss:$0 sm:$0xff] }
  0x14   :  { %162 = vmatpush.msra.mxu1 %v133_v31  ;;  %182 = vmatpush.msra.mxu2 %v134_v32  ;;  %v139_v39 = vld [vmem:[%s405_s6] sm:$0x3] }
  0x15   :  { %125 = vmatpush.msra.mxu0 %v98_v8  ;;  %v141_v40 = vperm.slane %v139_v39, 0  ;;  %v142_v43 = vperm.slane %v139_v39, 1 }
  0x16   :  { %224 = vset.pattern.permute.xlu0 %v320_v3  ;;  %226 = vset.pattern.permute.xlu1 %v321_v4 }
  0x17   :  { %70 = vperm.xlu0 %224, %v59_v2   ;;  %86 = vperm.xlu1 %226, %v59_v2  }
  0x18   :  { %163 = vmatpush.msra.mxu1 %v131_v33  ;;  %183 = vmatpush.msra.mxu2 %v132_v34 }
  0x1f   :  { %227 = vset.pattern.permute.xlu0 %v321_v4 }
  0x80   :  { %v64_v11 = vpop.permute.xlu0 %63  ;;  %v79_v12 = vpop.permute.xlu1 %78 }
  0x81   :  { %v67_v19 = vmul.f32 %v228_v13, %v64_v11  ;;  %v82_v21 = vmul.f32 %v229_v15, %v79_v12 }
  0x89   :  { %v71_v17 = vpop.permute.xlu0 %70  ;;  %v87_v18 = vpop.permute.xlu1 %86 }
  0x8a   :  { %v74_v20 = vmul.f32 %v230_v14, %v71_v17  ;;  %v90_v23 = vmul.f32 %v231_v16, %v87_v18 }
  0x8c   :  { %v75_v22 = vadd.f32 %v74_v20, %v67_v19 }
  0x8e   :  { %v83_v24 = vadd.f32 %v82_v21, %v75_v22 }
  0x90   :  { %v91_v26 = vadd.f32 %v90_v23, %v83_v24 }
  0x92   :  { %v96_v27 = vadd.f32 %v232_v25, %v91_v26 }
  0x94   :  { %v97_v28 = vmax.f32 %v96_v27, 0.0 }
  0x96   :  { %209 = vmatmul.msk.f32.vlgmr.msra.gmra.mxu0 %vm106_vm0, %v97_v28 }
 0x113   :  { %v127_v36 = vpop.f32.mrf.mxu0 }
 0x114   :  { %v128_v37 = vadd.f32 %v233_v35, %v127_v36 }
 0x116   :  { %v130_v38 = vmax.f32 %v128_v37, 0.0 }
 0x118   :  { %210 = vmatmul.msk.f32.vlgmr.msra.gmra.mxu1 %vm106_vm0, %v130_v38  ;;  %211 = vmatmul.msk.f32.vlgmr.msra.gmra.mxu2 %vm106_vm0, %v130_v38 }
 0x195   :  { %v165_v41 = vpop.f32.mrf.mxu1 }
 0x196   :  { %v166_v42 = vadd.f32 %v165_v41, %v141_v40 }
 0x198   :  { %188 = vst [vmem:[#allocation7] sm:$0xff] %v166_v42 }
 0x19b   :  { %v185_v44 = vpop.f32.mrf.mxu2 }
 0x19c   :  { %v186_v45 = vadd.f32 %v185_v44, %v142_v43 }
 0x19e   :  { %190 = vst.msk [vmem:[#allocation7 + $0x8] sm:$0xff] %vm189_vm1, %v186_v45 }
 0x19f   :  { %201 = dma.vmem_to_hbm [thread:$0]  %s197_s27, 256, %s199_s29, [#allocation4]  }
 0x1a0   :  { %310 = dma.done.wait [#allocation4], 256  }
 0x1a1   :  { %311 = vsyncadd [#allocation4], 4294967040 }
 0x1a2   :  { %206 = vsyncpa [#allocation3], 1 }
 0x1a3   :  { %207 = vsyncpa [#allocation6], 1 }
 0x1a4   :  { %208 = vsyncpa [#allocation4], 1 }

</bundles_post_ra>
